<compile_context>
chip_gen: v7x
topology: tpu7x:2x2x1
jax: 0.10.0
libtpu: 0.0.40
codegen_flags: <defaults>
</compile_context>

<pallas_src>
import functools

import jax
import jax.numpy as jnp
from jax.experimental import pallas as pl
from jax.experimental.pallas import tpu as pltpu


def _round_up(x, m):
    return (x + m - 1) // m * m


def _ffn_kernel(x_ref, w1_ref, b1_ref, w2_ref, b2_ref, o_ref, *acc_refs, nk):
    # x_ref:  (tm, dp)   w1_ref: (dp, tk)   b1_ref: (1, tk)
    # w2_ref: (tk, dp)   b2_ref: (1, dp)    o_ref:  (tm, dp)
    # acc_refs: () when nk == 1, else ((tm, dp) f32 scratch,)
    h = jnp.dot(x_ref[...], w1_ref[...], preferred_element_type=jnp.float32)
    h = jnp.maximum(h + b1_ref[...], 0.0)           # fused bias + ReLU (f32)
    h = h.astype(x_ref.dtype)                       # fast MXU path for matmul 2
    contrib = jnp.dot(h, w2_ref[...], preferred_element_type=jnp.float32)

    if nk == 1:
        # Weight-resident fast path: single reduction step, no accumulator.
        o_ref[...] = (contrib + b2_ref[...]).astype(o_ref.dtype)
    else:
        (acc_ref,) = acc_refs
        k = pl.program_id(1)

        @pl.when(k == 0)
        def _():                      # first slab: plain write, no zero-init
            acc_ref[...] = contrib

        @pl.when(jnp.logical_and(k > 0, k < nk - 1))
        def _():
            acc_ref[...] += contrib

        @pl.when(k == nk - 1)
        def _():                      # fuse last contribution + b2 into store
            o_ref[...] = (acc_ref[...] + contrib + b2_ref[...]).astype(o_ref.dtype)

    # TODO(synk): training-mode dropout is stochastic; eval-mode identity here
    # (could be added with pltpu.prng_seed / prng_random_bits if needed).


def _footprint(tm, tk, nk, dp, itemsize):
    """Rough VMEM bytes for one grid step (double-buffered tiles + scratch)."""
    return (
        2 * tm * dp * itemsize            # x tiles
        + 2 * tm * dp * itemsize          # out tiles
        + 4 * dp * tk * itemsize          # W1^T + W2^T slabs (double-buffered)
        + 4 * (tk + dp) * 8 * itemsize    # biases (sublane-padded)
        + (tm * dp * 4 if nk > 1 else 0)  # f32 accumulator scratch
        + tm * tk * (4 + itemsize)        # live h intermediate (f32 + cast)
    )


@functools.partial(jax.jit, static_argnames=("tm", "max_tk"))
def positionwise_ffn(x, w1t, b1, w2t, b2, *, tm=512, max_tk=None):
    """x: [batch, seq, d_model] -> [batch, seq, d_model]."""
    batch, seq, d_model = x.shape
    d_ff = w1t.shape[1]
    M = batch * seq
    dtype = x.dtype
    itemsize = jnp.dtype(dtype).itemsize

    # ---- Generation-aware VMEM budget (v5e/v6e: 128 MiB, v7x: 64 MiB). ----
    try:
        vmem_cap = int(pltpu.get_tpu_info().vmem_capacity_bytes)
    except Exception:
        vmem_cap = 64 << 20                 # conservative: v7x per-TC VMEM
    vmem_budget = int(vmem_cap * 0.75)

    # ---- Row tile: large, but >= 2 row tiles so v7x's 2nd TC gets work. ----
    tm_eff = max(8, min(tm, _round_up(M, 8)))
    if M > 8:
        tm_eff = min(tm_eff, _round_up(-(-M // 2), 8))

    # ---- Lane-dense padded sizes (d_ff padded only to 128). ----
    dp = _round_up(d_model, 128)
    fp = _round_up(d_ff, 128)

    # ---- d_ff slab: prefer full residency (nk == 1); else a divisor of fp.
    lane_blocks = fp // 128
    cand = sorted(
        {d * 128 for d in range(1, lane_blocks + 1) if lane_blocks % d == 0},
        reverse=True,
    )
    if max_tk is not None:
        cand = [c for c in cand if c <= max_tk] or [128]

    tk_eff = cand[-1]
    fitted = False
    for c in cand:
        if _footprint(tm_eff, c, fp // c, dp, itemsize) <= vmem_budget:
            tk_eff = c
            fitted = True
            break
    if not fitted:
        # Last resort only: shrinking tm re-inflates weight traffic.
        while (tm_eff > 8 and
               _footprint(tm_eff, tk_eff, fp // tk_eff, dp, itemsize) > vmem_budget):
            tm_eff = max(8, _round_up(tm_eff // 2, 8))

    nk = fp // tk_eff
    mp = _round_up(M, tm_eff)
    n_row_tiles = mp // tm_eff

    # ---- Pad only what actually needs padding (skip the x copy if aligned).
    x2d = x.reshape(M, d_model)
    if mp != M or dp != d_model:
        x2d = jnp.pad(x2d, ((0, mp - M), (0, dp - d_model)))
    w1p = w1t
    if dp != d_model or fp != d_ff:
        w1p = jnp.pad(w1t, ((0, dp - d_model), (0, fp - d_ff)))
    w2p = w2t
    if fp != d_ff or dp != d_model:
        w2p = jnp.pad(w2t, ((0, fp - d_ff), (0, dp - d_model)))
    b1p = b1.reshape(1, d_ff)
    if fp != d_ff:
        b1p = jnp.pad(b1p, ((0, 0), (0, fp - d_ff)))
    b2p = b2.reshape(1, d_model)
    if dp != d_model:
        b2p = jnp.pad(b2p, ((0, 0), (0, dp - d_model)))

    grid = (n_row_tiles, nk)
    scratch = [] if nk == 1 else [pltpu.VMEM((tm_eff, dp), jnp.float32)]

    fit_bytes = _footprint(tm_eff, tk_eff, nk, dp, itemsize)
    vmem_limit = int(min(max(vmem_budget, int(fit_bytes * 1.3)),
                         int(vmem_cap * 0.9)))

    # Advisory cost estimate for XLA's scheduler.
    flops = 4 * mp * dp * fp
    weight_bytes = 2 * dp * fp * itemsize * (1 if nk == 1 else n_row_tiles)
    bytes_accessed = 2 * mp * dp * itemsize + weight_bytes + (fp + dp) * itemsize

    out2d = pl.pallas_call(
        functools.partial(_ffn_kernel, nk=nk),
        out_shape=jax.ShapeDtypeStruct((mp, dp), dtype),
        grid_spec=pltpu.PrefetchScalarGridSpec(
            num_scalar_prefetch=0,
            grid=grid,
            in_specs=[
                pl.BlockSpec((tm_eff, dp), lambda i, k: (i, 0)),    # x rows
                pl.BlockSpec((dp, tk_eff), lambda i, k: (0, k)),    # W1^T slab
                pl.BlockSpec((1, tk_eff), lambda i, k: (0, k)),     # b1 slab
                pl.BlockSpec((tk_eff, dp), lambda i, k: (k, 0)),    # W2^T slab
                pl.BlockSpec((1, dp), lambda i, k: (0, 0)),         # b2
            ],
            out_specs=pl.BlockSpec((tm_eff, dp), lambda i, k: (i, 0)),
            scratch_shapes=scratch,
        ),
        compiler_params=pltpu.CompilerParams(
            dimension_semantics=("parallel", "arbitrary"),
            vmem_limit_bytes=vmem_limit,
        ),
        cost_estimate=pl.CostEstimate(
            flops=flops, transcendentals=0, bytes_accessed=bytes_accessed),
    )(x2d, w1p, b1p, w2p, b2p)

    out = out2d
    if mp != M or dp != d_model:
        out = out[:M, :d_model]
    return out.reshape(batch, seq, d_model)


def _init_params(key, d_model, d_ff, dtype=jnp.float32):
    """Deterministic init matching nn.Linear shapes (stored transposed)."""
    k1, k2, k3, k4 = jax.random.split(key, 4)
    lim1 = 1.0 / (d_model ** 0.5)
    lim2 = 1.0 / (d_ff ** 0.5)
    # PyTorch Linear weight is (out, in); we store its transpose (in, out).
    w1t = jax.random.uniform(k1, (d_model, d_ff), dtype, -lim1, lim1)
    b1 = jax.random.uniform(k2, (d_ff,), dtype, -lim1, lim1)
    w2t = jax.random.uniform(k3, (d_ff, d_model), dtype, -lim2, lim2)
    b2 = jax.random.uniform(k4, (d_model,), dtype, -lim2, lim2)
    return w1t, b1, w2t, b2


def _reference(x, w1t, b1, w2t, b2):
    hp = jax.lax.Precision.HIGHEST
    h = jnp.maximum(jnp.einsum("bsd,df->bsf", x, w1t, precision=hp) + b1, 0.0)
    return jnp.einsum("bsf,fd->bsd", h, w2t, precision=hp) + b2


if __name__ == "__main__":
    key = jax.random.PRNGKey(0)

    # Case 1: toy module shapes (padding path + weight-resident fast path).
    batch, seq, d_model, d_ff = 2, 8, 32, 64
    kx, kp, key = jax.random.split(key, 3)
    x = jax.random.normal(kx, (batch, seq, d_model), jnp.float32)
    w1t, b1, w2t, b2 = _init_params(kp, d_model, d_ff)
    out = jax.block_until_ready(positionwise_ffn(x, w1t, b1, w2t, b2))
    ref = _reference(x, w1t, b1, w2t, b2)
    assert out.shape == x.shape
    assert jnp.allclose(out, ref, atol=1e-4, rtol=1e-4), "mismatch (case 1)"

    # Case 2: lane-aligned shapes forcing the streamed d_ff reduction path
    # (max_tk=128 -> 2 reduction steps -> exercises the accumulator branches).
    batch, seq, d_model, d_ff = 2, 16, 128, 256
    kx, kp, key = jax.random.split(key, 3)
    x = jax.random.normal(kx, (batch, seq, d_model), jnp.float32)
    w1t, b1, w2t, b2 = _init_params(kp, d_model, d_ff)
    out = jax.block_until_ready(
        positionwise_ffn(x, w1t, b1, w2t, b2, max_tk=128))
    ref = _reference(x, w1t, b1, w2t, b2)
    assert out.shape == x.shape
    assert jnp.allclose(out, ref, atol=1e-4, rtol=1e-4), "mismatch (case 2)"

    # Case 3: non-aligned d_model / d_ff and a ragged row count
    # (tight 128-lane padding, row-remainder padding, >= 2 row tiles).
    batch, seq, d_model, d_ff = 2, 12, 96, 320
    kx, kp, key = jax.random.split(key, 3)
    x = jax.random.normal(kx, (batch, seq, d_model), jnp.float32)
    w1t, b1, w2t, b2 = _init_params(kp, d_model, d_ff)
    out = jax.block_until_ready(positionwise_ffn(x, w1t, b1, w2t, b2))
    ref = _reference(x, w1t, b1, w2t, b2)
    assert out.shape == x.shape
    assert jnp.allclose(out, ref, atol=1e-4, rtol=1e-4), "mismatch (case 3)"

    print("KERNEL_OK")
</pallas_src>

<mosaic_0001>
module attributes {stable_mosaic.version = 11 : i64} {
  func.func @_ffn_kernel(%arg0: i32, %arg1: i32, %arg2: memref<8x128xf32, #tpu.memory_space<vmem>>, %arg3: memref<128x128xf32, #tpu.memory_space<vmem>>, %arg4: memref<1x128xf32, #tpu.memory_space<vmem>>, %arg5: memref<128x128xf32, #tpu.memory_space<vmem>>, %arg6: memref<1x128xf32, #tpu.memory_space<vmem>>, %arg7: memref<8x128xf32, #tpu.memory_space<vmem>>) attributes {dimension_semantics = [#tpu.dimension_semantics<parallel>, #tpu.dimension_semantics<arbitrary>], iteration_bounds = array<i64: 2, 1>, scalar_prefetch = 0 : i64, scratch_operands = 0 : i64, tpu.core_type = #tpu.core_type<tc>, window_params = [{transform_indices = @transform_0, window_bounds = array<i64: 8, 128>}, {transform_indices = @transform_1, window_bounds = array<i64: 128, 128>}, {transform_indices = @transform_2, window_bounds = array<i64: 1, 128>}, {transform_indices = @transform_3, window_bounds = array<i64: 128, 128>}, {pipeline_mode = #tpu.pipeline_mode<synchronous>, transform_indices = @transform_4, window_bounds = array<i64: 1, 128>}, {transform_indices = @transform_5, window_bounds = array<i64: 8, 128>}]} {
    %c0 = arith.constant 0 : index
    %c0_0 = arith.constant 0 : index
    %0 = vector.load %arg2[%c0, %c0_0] : memref<8x128xf32, #tpu.memory_space<vmem>>, vector<8x128xf32>
    %c0_1 = arith.constant 0 : index
    %c0_2 = arith.constant 0 : index
    %1 = vector.load %arg3[%c0_1, %c0_2] : memref<128x128xf32, #tpu.memory_space<vmem>>, vector<128x128xf32>
    %cst = arith.constant dense<0.000000e+00> : vector<8x128xf32>
    %2 = tpu.matmul %0, %1, %cst {dimension_numbers = #tpu.dot_dimension_numbers<[1], [0], [0], [1], [0, 0, 1, 1], [], []>} : vector<8x128xf32>, vector<128x128xf32>, vector<8x128xf32> -> vector<8x128xf32>
    %c0_3 = arith.constant 0 : index
    %c0_4 = arith.constant 0 : index
    %3 = vector.load %arg4[%c0_3, %c0_4] : memref<1x128xf32, #tpu.memory_space<vmem>>, vector<1x128xf32>
    %4 = vector.broadcast %3 : vector<1x128xf32> to vector<8x128xf32>
    %5 = arith.addf %2, %4 : vector<8x128xf32>
    %cst_5 = arith.constant 0.000000e+00 : f32
    %6 = vector.broadcast %cst_5 : f32 to vector<8x128xf32>
    %7 = arith.maximumf %5, %6 : vector<8x128xf32>
    %c0_6 = arith.constant 0 : index
    %c0_7 = arith.constant 0 : index
    %8 = vector.load %arg5[%c0_6, %c0_7] : memref<128x128xf32, #tpu.memory_space<vmem>>, vector<128x128xf32>
    %cst_8 = arith.constant dense<0.000000e+00> : vector<8x128xf32>
    %9 = tpu.matmul %7, %8, %cst_8 {dimension_numbers = #tpu.dot_dimension_numbers<[1], [0], [0], [1], [0, 0, 1, 1], [], []>} : vector<8x128xf32>, vector<128x128xf32>, vector<8x128xf32> -> vector<8x128xf32>
    %c0_9 = arith.constant 0 : index
    %c0_10 = arith.constant 0 : index
    %10 = vector.load %arg6[%c0_9, %c0_10] : memref<1x128xf32, #tpu.memory_space<vmem>>, vector<1x128xf32>
    %11 = vector.broadcast %10 : vector<1x128xf32> to vector<8x128xf32>
    %12 = arith.addf %9, %11 : vector<8x128xf32>
    %c0_11 = arith.constant 0 : index
    %c0_12 = arith.constant 0 : index
    %13 = vector.load %arg7[%c0_11, %c0_12] : memref<8x128xf32, #tpu.memory_space<vmem>>, vector<8x128xf32>
    tpu.vector_store %arg7[%c0_11, %c0_12], %12 {strides = array<i32>} : memref<8x128xf32, #tpu.memory_space<vmem>>, vector<8x128xf32>,
    return
  }
  func.func @transform_0(%arg0: i32, %arg1: i32) -> (i32, i32) {
    %c0_i32 = arith.constant 0 : i32
    %c0_i32_0 = arith.constant 0 : i32
    return %arg0, %c0_i32 : i32, i32
  }
  func.func @transform_1(%arg0: i32, %arg1: i32) -> (i32, i32) {
    %c0_i32 = arith.constant 0 : i32
    %c0_i32_0 = arith.constant 0 : i32
    return %c0_i32, %arg1 : i32, i32
  }
  func.func @transform_2(%arg0: i32, %arg1: i32) -> (i32, i32) {
    %c0_i32 = arith.constant 0 : i32
    %c0_i32_0 = arith.constant 0 : i32
    return %c0_i32, %arg1 : i32, i32
  }
  func.func @transform_3(%arg0: i32, %arg1: i32) -> (i32, i32) {
    %c0_i32 = arith.constant 0 : i32
    %c0_i32_0 = arith.constant 0 : i32
    return %arg1, %c0_i32 : i32, i32
  }
  func.func @transform_4(%arg0: i32, %arg1: i32) -> (i32, i32) {
    %c0_i32 = arith.constant 0 : i32
    %c0_i32_0 = arith.constant 0 : i32
    %c0_i32_1 = arith.constant 0 : i32
    return %c0_i32, %c0_i32_0 : i32, i32
  }
  func.func @transform_5(%arg0: i32, %arg1: i32) -> (i32, i32) {
    %c0_i32 = arith.constant 0 : i32
    %c0_i32_0 = arith.constant 0 : i32
    return %arg0, %c0_i32 : i32, i32
  }
}

</mosaic_0001>

<bundles_post_ra>
// kernel: positionwise_ffn.1
= control target key start
LH: loop header
LB: loop body
LE: loop exit
PB: predicated region body
PF: predicated region fallthrough
CT: control target
= control target key end

     0   :  { %s828_s18 = smov 0   ;;  %s830_s19 = smov 0   ;;  %s986_s0 = inlined_call_operand.vmem [shape: f32[16,128], index: 0, kind: input, shape index: {}]   ;;  %s987_s1 = inlined_call_operand.vmem [shape: f32[128,128], index: 1, kind: input, shape index: {}]   ;;  %s988_s2 = inlined_call_operand.vmem [shape: f32[1,128], index: 2, kind: input, shape index: {}]   ;;  %s989_s3 = inlined_call_operand.vmem [shape: f32[128,128], index: 3, kind: input, shape index: {}]   ;;  %s990_s4 = inlined_call_operand.vmem [shape: f32[1,128], index: 4, kind: input, shape index: {}]   ;;  %s991_s5 = inlined_call_operand.vmem [shape: f32[16,128], index: 5, kind: output, shape index: {}]  }
   0x1   :  { %s832_s20 = smov 0  }
   0x2 LB: > { %s27_s21 = sadd.s32 1, %s789_s19  ;;  %p585_p0 = scmp.ge.s32.totalorder %s793_s20, 1  ;;  %s793_s20 = sphi %s832_s20, %s15_s20   ;;  %s789_s19 = sphi %s830_s19, %s993_s19   ;;  %s785_s18 = sphi %s828_s18, %s992_s18  }
   0x3   : > { %p29_p1 = scmp.ge.s32.totalorder %s27_s21, 2  ;;  %p226_p2 = scmp.lt.s32.totalorder %s793_s20, 3 }
   0x5   : > { %s995_s21 = smov (%p29_p1, %s27_s21), 0  ;;  %p227_p3 = pnand %p585_p0, %p226_p2 }
   0x6   : > { %v286_v0 = vld [vmem:[%s987_s1] sm:$0xff] (!%p227_p3)  ;;  %v287_v1 = vld [vmem:[%s987_s1 + $0x8] sm:$0xff] (!%p227_p3)  ;;  %v288_v2 = vld [vmem:[%s987_s1 + $0x10] sm:$0xff] (!%p227_p3)  ;;  %v795_v3 = vmov (!%p227_p3), 0.0|0.0   ;;  %vm796_vm0 = vmmov (!%p227_p3), 0   ;;  %v797_v6 = vmov (!%p227_p3), 0.0  }
   0x7   : > { %230 = sbr.rel (%p227_p3) target bundleno = 471 (0x1d7), region = 40  ;;  %696 = vmatprep.subr.bf16.mxu0 (!%p227_p3), %v795_v3  ;;  %v697_v4 = vpack.c.bf16 (!%p227_p3), %v287_v1, %v286_v0  ;;  %v289_v5 = vld [vmem:[%s987_s1 + $0x18] sm:$0xff] (!%p227_p3)  ;;  %658 = vmatprep.mubr.msk.f32.mxu0 (!%p227_p3), %vm796_vm0, %v797_v6  ;;  %v290_v8 = vld [vmem:[%s987_s1 + $0x20] sm:$0xff] (!%p227_p3)  ;;  %v291_v9 = vld [vmem:[%s987_s1 + $0x28] sm:$0xff] (!%p227_p3)  ;;  %p264_p4 = scmp.lt.s32.totalorder (!%p227_p3), %s785_s18, 1 }
   0x8   : > { %720 = vmatprep.subr.bf16.mxu1 (!%p227_p3), %v795_v3  ;;  %693 = vmatprep.mubr.msk.f32.mxu1 (!%p227_p3), %vm796_vm0, %v797_v6  ;;  %v700_v7 = vpack.c.bf16 (!%p227_p3), %v289_v5, %v288_v2  ;;  %v380_v10 = vld [vmem:[%s989_s3] sm:$0xff] (!%p227_p3)  ;;  %v381_v11 = vld [vmem:[%s989_s3 + $0x8] sm:$0xff] (!%p227_p3)  ;;  %v382_v13 = vld [vmem:[%s989_s3 + $0x10] sm:$0xff] (!%p227_p3)  ;;  %v703_v15 = vpack.c.bf16 (!%p227_p3), %v291_v9, %v290_v8 }
   0x9   : > { %698 = vmatpush3.bf16.msra.mxu0 (!%p227_p3), %v697_v4  ;;  %v721_v12 = vpack.c.bf16 (!%p227_p3), %v381_v11, %v380_v10  ;;  %v383_v14 = vld [vmem:[%s989_s3 + $0x18] sm:$0xff] (!%p227_p3)  ;;  %v292_v16 = vld [vmem:[%s987_s1 + $0x30] sm:$0xff] (!%p227_p3)  ;;  %v384_v19 = vld [vmem:[%s989_s3 + $0x20] sm:$0xff] (!%p227_p3) }
   0xa   : > { %699 = vmatprep.subr.bf16.mxu0 (!%p227_p3), %v795_v3  ;;  %v293_v17 = vld [vmem:[%s987_s1 + $0x38] sm:$0xff] (!%p227_p3)  ;;  %v724_v18 = vpack.c.bf16 (!%p227_p3), %v383_v14, %v382_v13  ;;  %v385_v20 = vld [vmem:[%s989_s3 + $0x28] sm:$0xff] (!%p227_p3)  ;;  %v294_v22 = vld [vmem:[%s987_s1 + $0x40] sm:$0xff] (!%p227_p3) }
   0xb   : > { %722 = vmatpush3.bf16.msra.mxu1 (!%p227_p3), %v721_v12  ;;  %v706_v21 = vpack.c.bf16 (!%p227_p3), %v293_v17, %v292_v16  ;;  %v295_v23 = vld [vmem:[%s987_s1 + $0x48] sm:$0xff] (!%p227_p3)  ;;  %v727_v24 = vpack.c.bf16 (!%p227_p3), %v385_v20, %v384_v19  ;;  %v386_v25 = vld [vmem:[%s989_s3 + $0x30] sm:$0xff] (!%p227_p3)  ;;  %v387_v26 = vld [vmem:[%s989_s3 + $0x38] sm:$0xff] (!%p227_p3) }
   0xc   : > { %723 = vmatprep.subr.bf16.mxu1 (!%p227_p3), %v795_v3  ;;  %v709_v27 = vpack.c.bf16 (!%p227_p3), %v295_v23, %v294_v22  ;;  %v296_v28 = vld [vmem:[%s987_s1 + $0x50] sm:$0xff] (!%p227_p3)  ;;  %v297_v29 = vld [vmem:[%s987_s1 + $0x58] sm:$0xff] (!%p227_p3)  ;;  %v730_v30 = vpack.c.bf16 (!%p227_p3), %v387_v26, %v386_v25  ;;  %v388_v31 = vld [vmem:[%s989_s3 + $0x40] sm:$0xff] (!%p227_p3) }
   0xd   : > { %701 = vmatpush3.bf16.msra.mxu0 (!%p227_p3), %v700_v7  ;;  %v389_v32 = vld [vmem:[%s989_s3 + $0x48] sm:$0xff] (!%p227_p3)  ;;  %v712_v33 = vpack.c.bf16 (!%p227_p3), %v297_v29, %v296_v28  ;;  %v298_v34 = vld [vmem:[%s987_s1 + $0x60] sm:$0xff] (!%p227_p3)  ;;  %v390_v37 = vld [vmem:[%s989_s3 + $0x50] sm:$0xff] (!%p227_p3) }
   0xe   : > { %702 = vmatprep.subr.bf16.mxu0 %v795_v3  ;;  %v299_v35 = vld [vmem:[%s987_s1 + $0x68] sm:$0xff]  ;;  %v733_v36 = vpack.c.bf16 %v389_v32, %v388_v31  ;;  %s997_s18 = smov (!%p264_p4, %s785_s18), 1  ;;  %v391_v38 = vld [vmem:[%s989_s3 + $0x58] sm:$0xff]  ;;  %v300_v40 = vld [vmem:[%s987_s1 + $0x70] sm:$0xff] }
   0xf   : > { %725 = vmatpush3.bf16.msra.mxu1 %v724_v18  ;;  %v715_v39 = vpack.c.bf16 %v299_v35, %v298_v34  ;;  %v301_v41 = vld [vmem:[%s987_s1 + $0x78] sm:$0xff]  ;;  %v736_v42 = vpack.c.bf16 %v391_v38, %v390_v37  ;;  %s586_s11 = sshll.u32 %s997_s18, 3  ;;  %v392_v43 = vld [vmem:[%s989_s3 + $0x60] sm:$0xff]  ;;  %v393_v44 = vld [vmem:[%s989_s3 + $0x68] sm:$0xff] }
  0x10   : > { %726 = vmatprep.subr.bf16.mxu1 %v795_v3  ;;  %v718_v45 = vpack.c.bf16 %v301_v41, %v300_v40  ;;  %s267_s22 = scalar_lea.vmem %s986_s0, %s586_s11  ;;  %v739_v46 = vpack.c.bf16 %v393_v44, %v392_v43  ;;  %v394_v48 = vld [vmem:[%s989_s3 + $0x70] sm:$0xff]  ;;  %v395_v49 = vld [vmem:[%s989_s3 + $0x78] sm:$0xff]  ;;  %v588_v51 = vld [vmem:[%s988_s2] ss:$0 sm:$0xff]  ;;  %s284_s7 = scalar_lea.vmem %s991_s5, %s586_s11 }
  0x11   : > { %704 = vmatpush3.bf16.msra.mxu0 %v703_v15  ;;  %v285_v47 = vld [vmem:[%s267_s22] sm:$0xff]  ;;  %v742_v50 = vpack.c.bf16 %v395_v49, %v394_v48 }
  0x12   : > { %705 = vmatprep.subr.bf16.mxu0 %v795_v3  ;;  %v589_v56 = vld [vmem:[%s990_s4] ss:$0 sm:$0xff] }
  0x13   : > { %728 = vmatpush3.bf16.msra.mxu1 %v727_v24 }
  0x14   : > { %729 = vmatprep.subr.bf16.mxu1 %v795_v3 }
  0x15   : > { %707 = vmatpush3.bf16.msra.mxu0 %v706_v21 }
  0x16   : > { %708 = vmatprep.subr.bf16.mxu0 %v795_v3 }
  0x17   : > { %731 = vmatpush3.bf16.msra.mxu1 %v730_v30 }
  0x18   : > { %732 = vmatprep.subr.bf16.mxu1 %v795_v3 }
  0x19   : > { %710 = vmatpush3.bf16.msra.mxu0 %v709_v27 }
  0x1a   : > { %711 = vmatprep.subr.bf16.mxu0 %v795_v3 }
  0x1b   : > { %734 = vmatpush3.bf16.msra.mxu1 %v733_v36 }
  0x1c   : > { %735 = vmatprep.subr.bf16.mxu1 %v795_v3 }
  0x1d   : > { %713 = vmatpush3.bf16.msra.mxu0 %v712_v33 }
  0x1e   : > { %714 = vmatprep.subr.bf16.mxu0 %v795_v3 }
  0x1f   : > { %737 = vmatpush3.bf16.msra.mxu1 %v736_v42 }
  0x20   : > { %738 = vmatprep.subr.bf16.mxu1 %v795_v3 }
  0x21   : > { %716 = vmatpush3.bf16.msra.mxu0 %v715_v39 }
  0x22   : > { %717 = vmatprep.subr.bf16.mxu0 %v795_v3 }
  0x23   : > { %740 = vmatpush3.bf16.msra.mxu1 %v739_v46 }
  0x24   : > { %741 = vmatprep.subr.bf16.mxu1 %v795_v3 }
  0x25   : > { %719 = vmatpush3.bf16.msra.mxu0 %v718_v45 }
  0x27   : > { %743 = vmatpush3.bf16.msra.mxu1 %v742_v50 }
  0x28   : > { %659 = vmatmul.mubr.f32.vlgmr.msra.gmra.mrb[0].mxu0 %v285_v47 }
  0xfb   : > { %v375_v52 = vpop.f32.mrb[0].mxu0 }
  0xfc   : > { %v376_v53 = vadd.f32 %v588_v51, %v375_v52  ;;  %v660_v54 = vpop.f32.mrb[1].mxu0 }
  0xfe   : > { %v379_v55 = vmax.f32 %v376_v53, 0.0 }
 0x100   : > { %694 = vmatmul.mubr.f32.vlgmr.msra.gmra.mrb[0].mxu1 %v379_v55 }
 0x1d3   : > { %v469_v57 = vpop.f32.mrb[0].mxu1 }
 0x1d4   : > { %v470_v58 = vadd.f32 %v589_v56, %v469_v57  ;;  %v695_v59 = vpop.f32.mrb[1].mxu1 }
 0x1d6   : > { %473 = vst [vmem:[%s284_s7] sm:$0xff] %v470_v58 }
 0x1d7 PF: > { %s15_s20 = sadd.s32 1, %s793_s20   ;;  %s992_s18 = smov %s789_s19 }
 0x1d8   : > { %p12_p5 = scmp.ge.s32.totalorder %s15_s20, 4   ;;  %s993_s19 = smov %s995_s21 }
 0x1da   :  { %14 = sbr.rel (!%p12_p5) target bundleno = 2 (0x2), region = 79 }

</bundles_post_ra>
